<compile_context>
chip_gen: v7x
topology: tpu7x:2x2x1
jax: 0.10.0
libtpu: 0.0.40
codegen_flags: <defaults>
</compile_context>

<pallas_src>
import functools

import jax
import jax.numpy as jnp
from jax.experimental import pallas as pl
from jax.experimental.pallas import tpu as pltpu


def adagcn_kernel(x_ref, w1_ref, w2p_ref, out_ref, *, nclass, matmul_dtype):
    # x_ref:  [TM, nfeat]      gathered node-feature tile
    # w1_ref: [nhid, nfeat]    original fc0 weight layout (no wrapper transpose)
    # w2p_ref:[C_PAD, nhid]    fc1 weight, class dim zero-padded to 128 lanes
    # out_ref:[TM, C_PAD]      lane-dense log-softmax output tile
    x = x_ref[...].astype(matmul_dtype)
    w1 = w1_ref[...].astype(matmul_dtype)
    w2p = w2p_ref[...].astype(matmul_dtype)

    # fc0: contract the feature axes of x [TM, nfeat] and w1 [nhid, nfeat]
    # directly on the MXU; accumulate in f32.
    h = jax.lax.dot_general(
        x, w1, (((1,), (1,)), ((), ())), preferred_element_type=jnp.float32)
    h = jnp.maximum(h, 0.0)  # ReLU after fc0

    # fc1 against the lane-padded weight -> [TM, C_PAD] (lane-dense block).
    logits = jax.lax.dot_general(
        h.astype(matmul_dtype), w2p, (((1,), (1,)), ((), ())),
        preferred_element_type=jnp.float32)
    logits = jnp.maximum(logits, 0.0)  # ReLU after fc1 (reference applies it)

    # Mask the padded class columns so log_softmax equals the nclass-wide one.
    col = jax.lax.broadcasted_iota(jnp.int32, logits.shape, 1)
    logits = jnp.where(col < nclass, logits, jnp.float32(-1e30))

    # Numerically stable log_softmax over the class (lane) axis.
    m = jnp.max(logits, axis=-1, keepdims=True)
    shifted = logits - m
    lse = jnp.log(jnp.sum(jnp.exp(shifted), axis=-1, keepdims=True))
    out_ref[...] = (shifted - lse).astype(out_ref.dtype)


def adagcn_forward(x, adj, idx, w1, w2, *, block_rows=256,
                   matmul_dtype=jnp.float32):
    """x: [N, nfeat]; adj unused; idx: int row indices; w1: [nhid, nfeat]; w2: [nclass, nhid].

    Set matmul_dtype=jnp.bfloat16 on v6e/v7x for MXU peak (f32 accumulation is
    kept either way); default f32 matches the PyTorch f32 reference bit-for-bit
    at these scales.
    """
    del adj  # unused by the reference forward
    N, nfeat = x.shape
    nhid = w1.shape[0]
    nclass = w2.shape[0]

    # --- Gather the requested rows BEFORE compute -----------------------------
    M = int(idx.shape[0])
    block_rows = max(8, (block_rows // 8) * 8)
    TM = min(block_rows, max(8, ((M + 7) // 8) * 8))        # sublane-aligned tile
    M_pad = ((M + TM - 1) // TM) * TM
    idx_pad = jnp.concatenate(
        [idx.astype(jnp.int32), jnp.zeros((M_pad - M,), jnp.int32)])
    xg = jnp.take(x, idx_pad, axis=0)                       # [M_pad, nfeat]

    # --- Lane-dense class dimension (pad to a multiple of 128, min 128) -------
    C_PAD = max(128, ((nclass + 127) // 128) * 128)
    w2p = jnp.zeros((C_PAD, nhid), w2.dtype).at[:nclass].set(w2)

    grid = (M_pad // TM,)
    kernel = functools.partial(
        adagcn_kernel, nclass=nclass, matmul_dtype=matmul_dtype)

    cost = pl.CostEstimate(
        flops=2 * M_pad * nfeat * nhid + 2 * M_pad * nhid * C_PAD,
        transcendentals=M_pad * C_PAD,
        bytes_accessed=4 * (M_pad * nfeat + nhid * nfeat + C_PAD * nhid
                            + M_pad * C_PAD),
    )

    log_probs = pl.pallas_call(
        kernel,
        out_shape=jax.ShapeDtypeStruct((M_pad, C_PAD), jnp.float32),
        grid=grid,
        in_specs=[
            pl.BlockSpec((TM, nfeat), lambda i: (i, 0),
                         memory_space=pltpu.MemorySpace.VMEM),
            pl.BlockSpec((nhid, nfeat), lambda i: (0, 0),
                         memory_space=pltpu.MemorySpace.VMEM),
            pl.BlockSpec((C_PAD, nhid), lambda i: (0, 0),
                         memory_space=pltpu.MemorySpace.VMEM),
        ],
        out_specs=pl.BlockSpec((TM, C_PAD), lambda i: (i, 0),
                               memory_space=pltpu.MemorySpace.VMEM),
        compiler_params=pltpu.CompilerParams(
            dimension_semantics=("parallel",),      # rows independent -> both v7x TCs
            vmem_limit_bytes=32 * 1024 * 1024,      # safe on v5e/v6e/v7x
        ),
        cost_estimate=cost,
    )(xg, w1, w2p)

    # Strip row padding and the padded class lanes.
    return log_probs[:M, :nclass]


if __name__ == "__main__":
    # Small shapes consistent with the module: N nodes, nfeat -> nhid -> nclass.
    N, nfeat, nhid, nclass = 64, 32, 32, 8

    key = jax.random.PRNGKey(0)
    kx, kw1, kw2 = jax.random.split(key, 3)

    x = jax.random.normal(kx, (N, nfeat), dtype=jnp.float32)
    adj = jnp.eye(N, dtype=jnp.float32)  # unused, present for signature parity
    idx = jnp.array([0, 3, 5, 17, 42], dtype=jnp.int32)

    # Deterministic synthetic weights (Kaiming-uniform-like scaling).
    w1 = jax.random.uniform(kw1, (nhid, nfeat), jnp.float32,
                            minval=-1.0, maxval=1.0) * (1.0 / jnp.sqrt(nfeat))
    w2 = jax.random.uniform(kw2, (nclass, nhid), jnp.float32,
                            minval=-1.0, maxval=1.0) * (1.0 / jnp.sqrt(nhid))

    out = adagcn_forward(x, adj, idx, w1, w2)
    jax.block_until_ready(out)

    # Sanity check against a pure-JAX reference of the PyTorch forward.
    h_ref = jnp.maximum(x @ w1.T, 0.0)
    logits_ref = jnp.maximum(h_ref @ w2.T, 0.0)
    ref = jax.nn.log_softmax(logits_ref, axis=-1)[idx]
    assert out.shape == (idx.shape[0], nclass)
    assert jnp.allclose(out, ref, atol=1e-5), "mismatch vs JAX reference"

    print("KERNEL_OK")
</pallas_src>

<mosaic_0001>
module attributes {stable_mosaic.version = 11 : i64} {
  func.func @adagcn_kernel(%arg0: i32, %arg1: memref<8x32xf32, #tpu.memory_space<vmem>>, %arg2: memref<32x32xf32, #tpu.memory_space<vmem>>, %arg3: memref<128x32xf32, #tpu.memory_space<vmem>>, %arg4: memref<8x128xf32, #tpu.memory_space<vmem>>) attributes {dimension_semantics = [#tpu.dimension_semantics<parallel>], iteration_bounds = array<i64: 1>, scalar_prefetch = 0 : i64, scratch_operands = 0 : i64, tpu.core_type = #tpu.core_type<tc>, window_params = [{transform_indices = @transform_0, window_bounds = array<i64: 8, 32>}, {pipeline_mode = #tpu.pipeline_mode<synchronous>, transform_indices = @transform_1, window_bounds = array<i64: 32, 32>}, {pipeline_mode = #tpu.pipeline_mode<synchronous>, transform_indices = @transform_2, window_bounds = array<i64: 128, 32>}, {transform_indices = @transform_3, window_bounds = array<i64: 8, 128>}]} {
    %c0 = arith.constant 0 : index
    %c0_0 = arith.constant 0 : index
    %0 = vector.load %arg1[%c0, %c0_0] : memref<8x32xf32, #tpu.memory_space<vmem>>, vector<8x32xf32>
    %c0_1 = arith.constant 0 : index
    %c0_2 = arith.constant 0 : index
    %1 = vector.load %arg2[%c0_1, %c0_2] : memref<32x32xf32, #tpu.memory_space<vmem>>, vector<32x32xf32>
    %c0_3 = arith.constant 0 : index
    %c0_4 = arith.constant 0 : index
    %2 = vector.load %arg3[%c0_3, %c0_4] : memref<128x32xf32, #tpu.memory_space<vmem>>, vector<128x32xf32>
    %cst = arith.constant dense<0.000000e+00> : vector<8x32xf32>
    %3 = tpu.matmul %0, %1, %cst {dimension_numbers = #tpu.dot_dimension_numbers<[1], [1], [0], [0], [0, 0, 1, 0], [], []>} : vector<8x32xf32>, vector<32x32xf32>, vector<8x32xf32> -> vector<8x32xf32>
    %cst_5 = arith.constant 0.000000e+00 : f32
    %4 = vector.broadcast %cst_5 : f32 to vector<8x32xf32>
    %5 = arith.maximumf %3, %4 : vector<8x32xf32>
    %cst_6 = arith.constant dense<0.000000e+00> : vector<8x128xf32>
    %6 = tpu.matmul %5, %2, %cst_6 {dimension_numbers = #tpu.dot_dimension_numbers<[1], [1], [0], [0], [0, 0, 1, 0], [], []>} : vector<8x32xf32>, vector<128x32xf32>, vector<8x128xf32> -> vector<8x128xf32>
    %cst_7 = arith.constant 0.000000e+00 : f32
    %7 = vector.broadcast %cst_7 : f32 to vector<8x128xf32>
    %8 = arith.maximumf %6, %7 : vector<8x128xf32>
    %9 = tpu.iota {dimensions = array<i32: 1>} : vector<8x128xi32>
    %c8_i32 = arith.constant 8 : i32
    %10 = vector.broadcast %c8_i32 : i32 to vector<8x128xi32>
    %11 = arith.cmpi slt, %9, %10 : vector<8x128xi32>
    %cst_8 = arith.constant -1.000000e+30 : f32
    %12 = vector.broadcast %cst_8 : f32 to vector<8x128xf32>
    %13 = arith.select %11, %8, %12 : vector<8x128xi1>, vector<8x128xf32>
    %cst_9 = arith.constant dense<0xFF800000> : vector<8xf32>
    %14 = vector.multi_reduction <maximumf>, %13, %cst_9 [1] : vector<8x128xf32> to vector<8xf32>
    %15 = vector.shape_cast %14 : vector<8xf32> to vector<8x1xf32>
    %16 = vector.broadcast %15 : vector<8x1xf32> to vector<8x128xf32>
    %17 = arith.subf %13, %16 : vector<8x128xf32>
    %18 = math.exp %17 : vector<8x128xf32>
    %cst_10 = arith.constant dense<0.000000e+00> : vector<8xf32>
    %19 = vector.multi_reduction <add>, %18, %cst_10 [1] : vector<8x128xf32> to vector<8xf32>
    %20 = vector.shape_cast %19 : vector<8xf32> to vector<8x1xf32>
    %21 = math.log %20 : vector<8x1xf32>
    %22 = vector.broadcast %21 : vector<8x1xf32> to vector<8x128xf32>
    %23 = arith.subf %17, %22 : vector<8x128xf32>
    %c0_11 = arith.constant 0 : index
    %c0_12 = arith.constant 0 : index
    %24 = vector.load %arg4[%c0_11, %c0_12] : memref<8x128xf32, #tpu.memory_space<vmem>>, vector<8x128xf32>
    tpu.vector_store %arg4[%c0_11, %c0_12], %23 {strides = array<i32>} : memref<8x128xf32, #tpu.memory_space<vmem>>, vector<8x128xf32>,
    return
  }
  func.func @transform_0(%arg0: i32) -> (i32, i32) {
    %c0_i32 = arith.constant 0 : i32
    %c0_i32_0 = arith.constant 0 : i32
    return %arg0, %c0_i32 : i32, i32
  }
  func.func @transform_1(%arg0: i32) -> (i32, i32) {
    %c0_i32 = arith.constant 0 : i32
    %c0_i32_0 = arith.constant 0 : i32
    %c0_i32_1 = arith.constant 0 : i32
    return %c0_i32, %c0_i32_0 : i32, i32
  }
  func.func @transform_2(%arg0: i32) -> (i32, i32) {
    %c0_i32 = arith.constant 0 : i32
    %c0_i32_0 = arith.constant 0 : i32
    %c0_i32_1 = arith.constant 0 : i32
    return %c0_i32, %c0_i32_0 : i32, i32
  }
  func.func @transform_3(%arg0: i32) -> (i32, i32) {
    %c0_i32 = arith.constant 0 : i32
    %c0_i32_0 = arith.constant 0 : i32
    return %arg0, %c0_i32 : i32, i32
  }
}

</mosaic_0001>

<bundles_post_ra>
// kernel: tpu_custom_call.1
= control target key start
LH: loop header
LB: loop body
LE: loop exit
PB: predicated region body
PF: predicated region fallthrough
CT: control target
= control target key end

     0   :  { %vm36_vm0 = vcmask 261120   ;;  %v436_v2 = vmov 0.0|0.0   ;;  %vm437_vm2 = vmmov 0   ;;  %v438_v5 = vmov 0.0   ;;  %s563_s0 = inlined_call_operand.vmem [shape: f32[8,32], index: 0, kind: input, shape index: {}]   ;;  %s564_s1 = inlined_call_operand.vmem [shape: f32[32,32], index: 1, kind: input, shape index: {}]   ;;  %s565_s2 = inlined_call_operand.vmem [shape: f32[128,32], index: 2, kind: input, shape index: {}]   ;;  %s566_s3 = inlined_call_operand.hbm [shape: f32[8,128], index: 3, kind: output, shape index: {}]  }
   0x1   :  { %v16_v0 = vld [vmem:[%s564_s1] sm:$0xff]  ;;  %v17_v1 = vld [vmem:[%s564_s1 + $0x8] sm:$0xff]  ;;  %364 = vmatprep.subr.bf16.mxu0 %v436_v2  ;;  %vm468_vm1 = vmpackc.low %vm36_vm0, %vm36_vm0  ;;  %372 = vmatprep.subr.bf16.mxu1 %v436_v2 }
   0x2   :  { %v365_v3 = vpack.c.bf16 %v17_v1, %v16_v0  ;;  %326 = vmatprep.mubr.msk.f32.mxu0 %vm437_vm2, %v438_v5  ;;  %v20_v6 = vld [vmem:[%s565_s2] sm:$0xff]  ;;  %v21_v7 = vld [vmem:[%s565_s2 + $0x8] sm:$0xff]  ;;  %361 = vmatprep.mubr.msk.f32.mxu1 %vm437_vm2, %v438_v5  ;;  %v18_v9 = vld [vmem:[%s564_s1 + $0x10] sm:$0xff] }
   0x3   :  { %v373_v8 = vpack.c.bf16 %v21_v7, %v20_v6  ;;  %v19_v10 = vld [vmem:[%s564_s1 + $0x18] sm:$0xff]  ;;  %v22_v11 = vld [vmem:[%s565_s2 + $0x10] sm:$0xff] }
   0x4   :  { %367 = vmatpush3.bf16.xpose.msk.msra.mxu0 %vm468_vm1, %v365_v3  ;;  %v23_v12 = vld [vmem:[%s565_s2 + $0x18] sm:$0xff]  ;;  %v369_v13 = vpack.c.bf16 %v19_v10, %v18_v9 }
   0x5   :  { %368 = vmatprep.subr.bf16.mxu0 %v436_v2  ;;  %375 = vmatpush3.bf16.xpose.msk.msra.mxu1 %vm468_vm1, %v373_v8 }
   0x6   :  { %376 = vmatprep.subr.bf16.mxu1 %v436_v2 }
   0x7   :  { %8 = vsyncpa [#allocation3], 0  ;;  %v377_v14 = vpack.c.bf16 %v23_v12, %v22_v11  ;;  %v24_v15 = vld [vmem:[%s565_s2 + $0x20] sm:$0xff]  ;;  %v25_v16 = vld [vmem:[%s565_s2 + $0x28] sm:$0xff]  ;;  %v245_v37 = vlaneseq }
   0x8   :  { %v15_v17 = vld [vmem:[%s563_s0] sm:$0xff]  ;;  %v381_v18 = vpack.c.bf16 %v25_v16, %v24_v15  ;;  %v26_v19 = vld [vmem:[%s565_s2 + $0x30] sm:$0xff]  ;;  %v27_v20 = vld [vmem:[%s565_s2 + $0x38] sm:$0xff] }
   0x9   :  { %v385_v21 = vpack.c.bf16 %v27_v20, %v26_v19  ;;  %v28_v22 = vld [vmem:[%s565_s2 + $0x40] sm:$0xff]  ;;  %v29_v23 = vld [vmem:[%s565_s2 + $0x48] sm:$0xff]  ;;  %v30_v25 = vld [vmem:[%s565_s2 + $0x50] sm:$0xff]  ;;  %v246_v38 = vand.u32 127, %v245_v37 }
   0xa   :  { %v389_v24 = vpack.c.bf16 %v29_v23, %v28_v22  ;;  %v31_v26 = vld [vmem:[%s565_s2 + $0x58] sm:$0xff]  ;;  %v32_v28 = vld [vmem:[%s565_s2 + $0x60] sm:$0xff]  ;;  %v33_v29 = vld [vmem:[%s565_s2 + $0x68] sm:$0xff] }
   0xb   :  { %v393_v27 = vpack.c.bf16 %v31_v26, %v30_v25  ;;  %v397_v30 = vpack.c.bf16 %v33_v29, %v32_v28  ;;  %v34_v31 = vld [vmem:[%s565_s2 + $0x70] sm:$0xff]  ;;  %v35_v32 = vld [vmem:[%s565_s2 + $0x78] sm:$0xff]  ;;  %vm247_vm3 = vcmp.lt.s32.totalorder %v246_v38, 8  ;;  %s439_s2 = smov [#allocation2]  }
   0xc   :  { %371 = vmatpush3.bf16.xpose.msk.msra.mxu0 %vm468_vm1, %v369_v13  ;;  %v401_v33 = vpack.c.bf16 %v35_v32, %v34_v31  ;;  %s266_s25 = sshll.u32 %s439_s2, 4  ;;  %s267_s25 = int_to_ptr.vmem [resolvable:$true] %s266_s25 }
   0xd   :  { %379 = vmatpush3.bf16.xpose.msk.msra.mxu1 %vm468_vm1, %v377_v14  ;;  %s412_s26 = scalar_lea.vmem %s267_s25, 128  ;;  %p417_p1 = scmp.lt.s32.totalorder %s267_s25, %s267_s25 }
   0xe   :  { %380 = vmatprep.subr.bf16.mxu1 %v436_v2  ;;  %p413_p0 = scmp.ne.s32.totalorder %s267_s25, %s412_s26  ;;  %p418_p2 = scmp.lt.s32.totalorder %s412_s26, %s412_s26 }
  0x10   :  { %p419_p3 = por %p418_p2, %p417_p1 }
  0x12   :  { %p420_p4 = pnand %p419_p3, %p413_p0 }
  0x13   :  { %327 = vmatmul.mubr.msk.f32.vlgmr.msra.gmra.mrb[0].mxu0 %vm36_vm0, %v15_v17 }
  0x15   :  { %383 = vmatpush3.bf16.xpose.msk.msra.mxu1 %vm468_vm1, %v381_v18 }
  0x16   :  { %384 = vmatprep.subr.bf16.mxu1 %v436_v2 }
  0x1d   :  { %387 = vmatpush3.bf16.xpose.msk.msra.mxu1 %vm468_vm1, %v385_v21 }
  0x1e   :  { %388 = vmatprep.subr.bf16.mxu1 %v436_v2 }
  0x25   :  { %391 = vmatpush3.bf16.xpose.msk.msra.mxu1 %vm468_vm1, %v389_v24 }
  0x26   :  { %392 = vmatprep.subr.bf16.mxu1 %v436_v2 }
  0x2d   :  { %395 = vmatpush3.bf16.xpose.msk.msra.mxu1 %vm468_vm1, %v393_v27 }
  0x2e   :  { %396 = vmatprep.subr.bf16.mxu1 %v436_v2 }
  0x35   :  { %399 = vmatpush3.bf16.xpose.msk.msra.mxu1 %vm468_vm1, %v397_v30 }
  0x36   :  { %400 = vmatprep.subr.bf16.mxu1 %v436_v2 }
  0x3d   :  { %403 = vmatpush3.bf16.xpose.msk.msra.mxu1 %vm468_vm1, %v401_v33 }
  0xe6   :  { %v118_v34 = vpop.f32.mrb[0].mxu0 }
  0xe7   :  { %v122_v35 = vmax.f32 %v118_v34, 0.0  ;;  %v328_v36 = vpop.f32.mrb[1].mxu0 }
  0xe9   :  { %362 = vmatmul.mubr.msk.f32.vlgmr.msra.gmra.mrb[0].mxu1 %vm36_vm0, %v122_v35 }
 0x1bc   :  { %v240_v39 = vpop.f32.mrb[0].mxu1 }
 0x1bd   :  { %v244_v40 = vmax.f32 %v240_v39, 0.0  ;;  %v363_v41 = vpop.f32.mrb[1].mxu1 }
 0x1bf   :  { %v248_v42 = vsel %vm247_vm3, %v244_v40, -1e+30 }
 0x1c0   :  { %249 = vmax.xlane.f32.xlu0 %v248_v42 }
 0x24d   :  { %v250_v43 = vpop.xlane.xlu0 %249 }
 0x24e   :  { %v251_v44 = vsub.f32 %v248_v42, %v250_v43 }
 0x250   :  { %v252_v45 = vmul.f32 1.442695, %v251_v44 }
 0x252   :  { %408 = vpow2.f32 %v252_v45 }
 0x25c   :  { %v409_v46 = vpop.eup %408 }
 0x25d   :  { %254 = vadd.xlane.f32.xlu0 %v409_v46 }
 0x2ea   :  { %v255_v47 = vpop.xlane.xlu0 %254 }
 0x2eb   :  { %410 = vlog2.f32 %v255_v47 }
 0x2f5   :  { %v411_v48 = vpop.eup %410 }
 0x2f6   :  { %v257_v49 = vmul.f32 0.6931472, %v411_v48 }
 0x2f8   :  { %v258_v50 = vsub.f32 %v251_v44, %v257_v49 }
 0x2fa   :  { %259 = vst [vmem:[#allocation2] sm:$0xff] %v258_v50 }
 0x2fb   :  { %423 = shalt.err (!%p420_p4)
}
 0x2fc   :  { %s424_s28 = scalar_lea.hbm %s566_s3, 128 }
 0x2fd   :  { %p425_p5 = scmp.ne.s32.totalorder %s566_s3, %s424_s28  ;;  %p428_p6 = scmp.lt.u32.totalorder %s424_s28, %s566_s3 }
 0x2ff   :  { %p430_p7 = pnand %p428_p6, %p425_p5 }
 0x301   :  { %433 = shalt.err (!%p430_p7)
}
 0x302   :  { %269 = dma.vmem_to_hbm [thread:$0]  %s267_s25, 128, %s566_s3, [#allocation3]  }
 0x303   :  { %434 = dma.done.wait [#allocation3], 128  }
 0x304   :  { %435 = vsyncadd [#allocation3], 4294967168 }
 0x305   :  { %273 = vsyncpa [#allocation3], 1 }

</bundles_post_ra>
